<compile_context>
chip_gen: v7x
topology: tpu7x:2x2x1
jax: 0.10.0
libtpu: 0.0.40
codegen_flags: <defaults>
</compile_context>

<pallas_src>
import functools

import jax
import jax.numpy as jnp
import numpy as np
from jax.experimental import pallas as pl
from jax.experimental.pallas import tpu as pltpu


# ----------------------------------------------------------------------------
# Pallas kernels
# ----------------------------------------------------------------------------
def _normalize_kernel(x_ref, scale_ref, bias_ref, o_ref):
    # (x - mean) / std  ==  x * (1/std) + (-mean/std); the multiply rides the
    # 4 VALU slots instead of the single-slot EUP divide.
    o_ref[...] = x_ref[...] * scale_ref[...] + bias_ref[...]


def _cls_head_kernel(logits_ref, sig_ref, probs_ref):
    # logits: (Q, C) -> sigmoid and softmax-over-classes of the sigmoid.
    logits = logits_ref[...].astype(jnp.float32)
    sig = jax.nn.sigmoid(logits)                       # logits.sigmoid()
    m = jnp.max(sig, axis=1, keepdims=True)            # single XLU reduction
    e = jnp.exp(sig - m)
    probs = e / jnp.sum(e, axis=1, keepdims=True)      # logits_sigmoid.softmax(1)
    sig_ref[...] = sig
    probs_ref[...] = probs


def _fused_mask_kernel(m_ref, lh_ref, lwt_ref, o_ref, *, frames_per_block, h):
    # One (query, frame-block) tile per grid point.
    #   m:   (1, F*h, w)     bf16  low-res mask logits (frames stacked on rows)
    #   lh:  (Ohp, h)        bf16  composed nearest @ crop @ bilinear (rows, 8-pad)
    #   lwt: (w, Owp)        bf16  composed cols, pre-transposed + 128-pad
    #   out: (1, F, Ohp, Owp) int8   (mask logit > 0)  <=>  sigmoid(mask) > 0.5
    m = m_ref[0]                                        # (F*h, w)
    lwt = lwt_ref[...]                                  # (w, Owp)
    lh = lh_ref[...]                                    # (Ohp, h)
    # Right matmul batched over frames: (F*h, w) @ (w, Owp) -> (F*h, Owp) on MXU,
    # lane-dense N >= 128, f32 accumulation.
    r = jnp.dot(m, lwt, preferred_element_type=jnp.float32).astype(jnp.bfloat16)
    for t in range(frames_per_block):                   # static unroll, F is small
        seg = r[t * h:(t + 1) * h, :]                   # (h, Owp) static slice
        up = jnp.dot(lh, seg, preferred_element_type=jnp.float32)  # (Ohp, Owp)
        o_ref[0, t] = (up > 0.0).astype(jnp.int8)       # unmasked lane-dense store


# ----------------------------------------------------------------------------
# Helpers (host-side, numpy; shapes are static so these fold under jit)
# ----------------------------------------------------------------------------
def _bilinear_matrix(out_size, in_size):
    """PyTorch F.interpolate(mode='bilinear', align_corners=False) as a matrix."""
    scale = in_size / out_size
    src = (np.arange(out_size, dtype=np.float64) + 0.5) * scale - 0.5
    src = np.clip(src, 0.0, in_size - 1)
    lo = np.floor(src).astype(np.int64)
    hi = np.minimum(lo + 1, in_size - 1)
    frac = src - lo
    mat = np.zeros((out_size, in_size), dtype=np.float64)
    mat[np.arange(out_size), lo] += 1.0 - frac
    mat[np.arange(out_size), hi] += frac
    return mat


def _nearest_matrix(out_size, in_size):
    """PyTorch F.interpolate(mode='nearest') as a 0/1 selection matrix."""
    idx = np.floor(np.arange(out_size) * (in_size / out_size)).astype(np.int64)
    idx = np.clip(idx, 0, in_size - 1)
    mat = np.zeros((out_size, in_size), dtype=np.float64)
    mat[np.arange(out_size), idx] = 1.0
    return mat


def _compose_resize_matrices(h, w, mask_stride, image_size, ori_size,
                             sublane_pad=8, lane_pad=128):
    """Compose bilinear upsample (x mask_stride), crop to image_size, nearest
    resize to ori_size into one pair of matrices.  Exact: crop/nearest are row
    selections and commute with the elementwise sigmoid."""
    img_h, img_w = image_size
    ori_h, ori_w = ori_size
    assert img_h <= h * mask_stride and img_w <= w * mask_stride
    wh = _bilinear_matrix(h * mask_stride, h)          # (Ho, h)
    ww = _bilinear_matrix(w * mask_stride, w)          # (Wo, w)
    nh = _nearest_matrix(ori_h, img_h)                 # (ori_h, img_h)
    nw = _nearest_matrix(ori_w, img_w)                 # (ori_w, img_w)
    lh = nh @ wh[:img_h, :]                            # (ori_h, h)
    lw = nw @ ww[:img_w, :]                            # (ori_w, w)
    ohp = -(-ori_h // sublane_pad) * sublane_pad       # sublane-dense output height
    owp = -(-ori_w // lane_pad) * lane_pad             # lane-dense output width
    lhp = np.zeros((ohp, h), dtype=np.float32)         # zero rows -> logit 0 -> False
    lhp[:ori_h, :] = lh
    lwt = np.zeros((w, owp), dtype=np.float32)         # pre-transposed, zero-padded
    lwt[:, :ori_w] = lw.T
    return (jnp.asarray(lhp, dtype=jnp.bfloat16),
            jnp.asarray(lwt, dtype=jnp.bfloat16))


def _pick_lane_block(total, target=4096):
    """Largest multiple of 128 that divides `total` and is <= target (else full row)."""
    if total <= target or total % 128 != 0:
        return total
    best = 128
    b = 256
    while b <= target:
        if total % b == 0:
            best = b
        b += 128
    return best


def _pick_frame_block(t, max_frames=4):
    """Largest divisor of t <= max_frames (bounds per-grid-step VMEM footprint)."""
    for f in range(min(t, max_frames), 0, -1):
        if t % f == 0:
            return f
    return 1


# ----------------------------------------------------------------------------
# Wrappers
# ----------------------------------------------------------------------------
@functools.partial(jax.jit, static_argnums=(3,))
def normalize_images(images, pixel_mean, pixel_std, lane_block_target=4096):
    """SeqFormer.preprocess_image: (x - pixel_mean) / pixel_std per frame.

    Tiled over the pixel axis so real-sized frames pipeline HBM<->VMEM instead of
    requiring the whole (N*C, H*W) slab resident (v7x has only 64 MiB VMEM)."""
    n, c, h, w = images.shape
    total = h * w
    x2d = images.reshape(n * c, total)
    inv_std = 1.0 / pixel_std
    scale2d = jnp.tile(inv_std.reshape(c, 1), (n, 1))
    bias2d = jnp.tile((-pixel_mean * inv_std).reshape(c, 1), (n, 1))
    lb = _pick_lane_block(total, lane_block_target)
    out = pl.pallas_call(
        _normalize_kernel,
        out_shape=jax.ShapeDtypeStruct((n * c, total), jnp.float32),
        grid=(total // lb,),
        in_specs=[
            pl.BlockSpec((n * c, lb), lambda j: (0, j)),
            pl.BlockSpec((n * c, 1), lambda j: (0, 0)),
            pl.BlockSpec((n * c, 1), lambda j: (0, 0)),
        ],
        out_specs=pl.BlockSpec((n * c, lb), lambda j: (0, j)),
        compiler_params=pltpu.CompilerParams(dimension_semantics=("parallel",)),
    )(x2d, scale2d, bias2d)
    return out.reshape(n, c, h, w)


def class_head(pred_logits):
    """sigmoid + softmax(1) of pred_logits (Q, C) in one small kernel.

    max / argmax / topk stay in XLA: the tensor is a few KB and a pallas_call
    would be launch-overhead dominated; it also avoids (Q, 1) masked stores."""
    q, c = pred_logits.shape
    return pl.pallas_call(
        _cls_head_kernel,
        out_shape=(
            jax.ShapeDtypeStruct((q, c), jnp.float32),   # logits_sigmoid
            jax.ShapeDtypeStruct((q, c), jnp.float32),   # logits_probs
        ),
        in_specs=[pl.BlockSpec(memory_space=pltpu.MemorySpace.VMEM)],
        out_specs=(pl.BlockSpec(memory_space=pltpu.MemorySpace.VMEM),) * 2,
    )(pred_logits)


def fused_mask_head(sel_masks, lh, lwt, ori_h, ori_w):
    """(K, T, h, w) mask logits -> (K, T, ori_h, ori_w) boolean masks.

    Single pallas_call fusing: bilinear upsample x mask_stride, sigmoid, crop to
    the valid image region, nearest resize to ori_size, and the >0.5 threshold
    (applied pre-sigmoid as >0).  bf16 matmuls with f32 accumulation; the right
    matrix is pre-transposed + zero-padded so output stores are lane-dense; the
    result goes straight to HBM as int8 (no f32 intermediate round-trip)."""
    k, t, h, w = sel_masks.shape
    ohp = lh.shape[0]
    owp = lwt.shape[1]
    fb = _pick_frame_block(t)          # frames batched into each grid step
    m2 = sel_masks.reshape(k, t * h, w).astype(jnp.bfloat16)
    kernel = functools.partial(_fused_mask_kernel, frames_per_block=fb, h=h)
    out = pl.pallas_call(
        kernel,
        out_shape=jax.ShapeDtypeStruct((k, t, ohp, owp), jnp.int8),
        grid=(k, t // fb),
        in_specs=[
            pl.BlockSpec((1, fb * h, w), lambda i, j: (i, j, 0)),
            pl.BlockSpec((ohp, h), lambda i, j: (0, 0)),
            pl.BlockSpec((w, owp), lambda i, j: (0, 0)),
        ],
        out_specs=pl.BlockSpec((1, fb, ohp, owp), lambda i, j: (i, j, 0, 0)),
        compiler_params=pltpu.CompilerParams(
            dimension_semantics=("parallel", "parallel")),
    )(m2, lh, lwt)
    return out[..., :ori_h, :ori_w].astype(jnp.bool_)


@functools.partial(jax.jit, static_argnums=(2, 3, 4, 5))
def _whole_video_core(pred_logits, pred_masks, ori_size, image_size,
                      mask_stride, n_topk):
    sig, probs = class_head(pred_logits)
    scores1d = jnp.max(sig, axis=1)                       # logits_sigmoid.max(1)
    labels1d = jnp.argmax(sig, axis=1).astype(jnp.int32)  # first-occurrence argmax

    # topk over per-query max sigmoid score (torch.topk)
    _, topk_idx = jax.lax.top_k(scores1d, n_topk)
    valid_sigmoid = sig[topk_idx]
    valid_probs = probs[topk_idx]
    sel_masks = pred_masks[topk_idx]                      # (K, T, h, w)

    _, _, h, w = sel_masks.shape
    lh, lwt = _compose_resize_matrices(h, w, mask_stride, image_size, ori_size)
    out_masks = fused_mask_head(sel_masks, lh, lwt, ori_size[0], ori_size[1])

    return (scores1d[topk_idx], labels1d[topk_idx],
            jnp.max(valid_probs, axis=-1), out_masks, valid_sigmoid)


def whole_video_inference(pred_logits, pred_masks, ori_size, image_size,
                          mask_stride=4, n_topk=3):
    """Mirrors SeqFormer.whole_video_inference (single-class path) for one video."""
    scores, labels, max_probs, out_masks, valid_sigmoid = _whole_video_core(
        pred_logits, pred_masks, tuple(ori_size), tuple(image_size),
        int(mask_stride), int(n_topk))
    return {
        "image_size": ori_size,
        "pred_scores": scores,
        "pred_labels": labels,
        "pred_probs": max_probs,
        "pred_masks": out_masks,
        "valid_sigmoid": valid_sigmoid,
    }


# ----------------------------------------------------------------------------
# Driver
# ----------------------------------------------------------------------------
if __name__ == "__main__":
    key = jax.random.PRNGKey(0)
    k_img, k_logit, k_mask = jax.random.split(key, 3)

    # small, SeqFormer-consistent shapes
    num_frames = 2
    img_h, img_w = 32, 32
    num_queries = 8
    num_classes = 4
    mask_h, mask_w = 16, 16
    mask_stride = 4
    n_topk = 3

    # raw video frames, NCHW (num_frames, 3, H, W)
    images = jax.random.uniform(k_img, (num_frames, 3, img_h, img_w),
                                dtype=jnp.float32) * 255.0
    pixel_mean = jnp.asarray([123.675, 116.28, 103.53], dtype=jnp.float32)
    pixel_std = jnp.asarray([58.395, 57.12, 57.375], dtype=jnp.float32)

    # synthetic detector outputs (stand-in for detr.inference(images))
    pred_logits = jax.random.normal(k_logit, (num_queries, num_classes),
                                    dtype=jnp.float32)
    pred_masks = jax.random.normal(
        k_mask, (num_queries, num_frames, mask_h, mask_w), dtype=jnp.float32)

    # 1) preprocess_image normalization (Pallas, tiled; small target so the toy
    #    shape actually exercises grid > 1)
    norm_images = normalize_images(images, pixel_mean, pixel_std, 512)
    jax.block_until_ready(norm_images)

    # correctness check against the straightforward JAX reference
    ref_norm = (images - pixel_mean.reshape(1, 3, 1, 1)) / pixel_std.reshape(1, 3, 1, 1)
    np.testing.assert_allclose(np.asarray(norm_images), np.asarray(ref_norm),
                               rtol=1e-4, atol=1e-3)

    # class head correctness check (sigmoid + softmax(1))
    sig_k, probs_k = class_head(pred_logits)
    jax.block_until_ready(probs_k)
    sig_ref = jax.nn.sigmoid(pred_logits)
    probs_ref = jax.nn.softmax(sig_ref, axis=1)
    np.testing.assert_allclose(np.asarray(sig_k), np.asarray(sig_ref),
                               rtol=1e-5, atol=1e-6)
    np.testing.assert_allclose(np.asarray(probs_k), np.asarray(probs_ref),
                               rtol=1e-4, atol=1e-6)

    # 2/3) whole_video_inference class head + fused mask post-processing (Pallas)
    image_size = (28, 30)   # valid (unpadded) region inside the padded mask grid
    ori_size = (40, 44)     # requested output resolution
    out = whole_video_inference(pred_logits, pred_masks, ori_size, image_size,
                                mask_stride=mask_stride, n_topk=n_topk)

    jax.block_until_ready(out["pred_masks"])
    jax.block_until_ready(out["pred_scores"])
    jax.block_until_ready(out["pred_labels"])
    jax.block_until_ready(out["pred_probs"])

    assert norm_images.shape == (num_frames, 3, img_h, img_w)
    assert out["pred_masks"].shape == (n_topk, num_frames, ori_size[0], ori_size[1])
    assert out["pred_masks"].dtype == jnp.bool_
    assert out["pred_scores"].shape == (n_topk,)
    assert out["pred_labels"].shape == (n_topk,)
    assert out["pred_probs"].shape == (n_topk,)
    print("KERNEL_OK")
</pallas_src>

<mosaic_0001>
module attributes {stable_mosaic.version = 11 : i64} {
  func.func @_normalize_kernel(%arg0: i32, %arg1: memref<6x512xf32, #tpu.memory_space<vmem>>, %arg2: memref<6x1xf32, #tpu.memory_space<vmem>>, %arg3: memref<6x1xf32, #tpu.memory_space<vmem>>, %arg4: memref<6x512xf32, #tpu.memory_space<vmem>>) attributes {dimension_semantics = [#tpu.dimension_semantics<parallel>], iteration_bounds = array<i64: 2>, scalar_prefetch = 0 : i64, scratch_operands = 0 : i64, tpu.core_type = #tpu.core_type<tc>, window_params = [{transform_indices = @transform_0, window_bounds = array<i64: 6, 512>}, {pipeline_mode = #tpu.pipeline_mode<synchronous>, transform_indices = @transform_1, window_bounds = array<i64: 6, 1>}, {pipeline_mode = #tpu.pipeline_mode<synchronous>, transform_indices = @transform_2, window_bounds = array<i64: 6, 1>}, {transform_indices = @transform_3, window_bounds = array<i64: 6, 512>}]} {
    %c0 = arith.constant 0 : index
    %c0_0 = arith.constant 0 : index
    %0 = vector.load %arg1[%c0, %c0_0] : memref<6x512xf32, #tpu.memory_space<vmem>>, vector<6x512xf32>
    %c0_1 = arith.constant 0 : index
    %c0_2 = arith.constant 0 : index
    %1 = vector.load %arg2[%c0_1, %c0_2] : memref<6x1xf32, #tpu.memory_space<vmem>>, vector<6x1xf32>
    %2 = vector.broadcast %1 : vector<6x1xf32> to vector<6x512xf32>
    %3 = arith.mulf %0, %2 : vector<6x512xf32>
    %c0_3 = arith.constant 0 : index
    %c0_4 = arith.constant 0 : index
    %4 = vector.load %arg3[%c0_3, %c0_4] : memref<6x1xf32, #tpu.memory_space<vmem>>, vector<6x1xf32>
    %5 = vector.broadcast %4 : vector<6x1xf32> to vector<6x512xf32>
    %6 = arith.addf %3, %5 : vector<6x512xf32>
    %c0_5 = arith.constant 0 : index
    %c0_6 = arith.constant 0 : index
    %7 = vector.load %arg4[%c0_5, %c0_6] : memref<6x512xf32, #tpu.memory_space<vmem>>, vector<6x512xf32>
    tpu.vector_store %arg4[%c0_5, %c0_6], %6 {strides = array<i32>} : memref<6x512xf32, #tpu.memory_space<vmem>>, vector<6x512xf32>,
    return
  }
  func.func @transform_0(%arg0: i32) -> (i32, i32) {
    %c0_i32 = arith.constant 0 : i32
    %c0_i32_0 = arith.constant 0 : i32
    return %c0_i32, %arg0 : i32, i32
  }
  func.func @transform_1(%arg0: i32) -> (i32, i32) {
    %c0_i32 = arith.constant 0 : i32
    %c0_i32_0 = arith.constant 0 : i32
    %c0_i32_1 = arith.constant 0 : i32
    return %c0_i32, %c0_i32_0 : i32, i32
  }
  func.func @transform_2(%arg0: i32) -> (i32, i32) {
    %c0_i32 = arith.constant 0 : i32
    %c0_i32_0 = arith.constant 0 : i32
    %c0_i32_1 = arith.constant 0 : i32
    return %c0_i32, %c0_i32_0 : i32, i32
  }
  func.func @transform_3(%arg0: i32) -> (i32, i32) {
    %c0_i32 = arith.constant 0 : i32
    %c0_i32_0 = arith.constant 0 : i32
    return %c0_i32, %arg0 : i32, i32
  }
}

</mosaic_0001>

<bundles_post_ra>
// kernel: normalize_images.1
= control target key start
LH: loop header
LB: loop body
LE: loop exit
PB: predicated region body
PF: predicated region fallthrough
CT: control target
= control target key end

     0   :  { %s308_s12 = smov 0   ;;  %s331_s0 = inlined_call_operand.vmem [shape: f32[6,1024], index: 0, kind: input, shape index: {}]   ;;  %s332_s1 = inlined_call_operand.vmem [shape: f32[6,1], index: 1, kind: input, shape index: {}]   ;;  %s333_s2 = inlined_call_operand.vmem [shape: f32[6,1], index: 2, kind: input, shape index: {}]   ;;  %s334_s3 = inlined_call_operand.vmem [shape: f32[6,1024], index: 3, kind: output, shape index: {}]  }
   0x1 LB: > { %s258_s13 = sadd.s32 4294967295, %s285_s12   ;;  %p262_p0 = scmp.ge.s32.totalorder %s285_s12, 1  ;;  %s285_s12 = sphi %s308_s12, %s13_s12  }
   0x2   : > { %p138_p1 = scmp.lt.s32.totalorder %s285_s12, 3 }
   0x4   : > { %p139_p2 = pnand %p262_p0, %p138_p1 }
   0x5   : > { %v178_v0 = vld [vmem:[%s332_s1] sm:$0x3f] (!%p139_p2)  ;;  %v287_v1 = vmov (!%p139_p2), 0   ;;  %s263_s18 = sshll.u32 (!%p139_p2), %s258_s13, 2 }
   0x6   : > { %142 = sbr.rel (%p139_p2) target bundleno = 143 (0x8f), region = 32  ;;  %278 = vset.pattern.permute.xlu0 (!%p139_p2), %v287_v1  ;;  %v188_v2 = vld [vmem:[%s333_s2] sm:$0x3f] (!%p139_p2)  ;;  %p163_p3 = scmp.lt.s32.totalorder (!%p139_p2), %s263_s18, 7 }
   0x7   : > { %181 = vperm.xlu0 (!%p139_p2), %278, %v178_v0  }
   0xb   : > { %191 = vperm.xlu0 (!%p139_p2), %278, %v188_v2  }
   0xd   : > { %s336_s18 = smov (!%p163_p3, %s263_s18), 7 }
   0xe   : > { %s264_s19 = sshll.u32 %s336_s18, 3 }
   0xf   : > { %s166_s22 = scalar_lea.vmem %s331_s0, %s264_s19  ;;  %s172_s25 = scalar_lea.vmem %s334_s3, %s264_s19 }
  0x10   : > { %v174_v4 = vld [vmem:[%s166_s22] sm:$0x3f]  ;;  %v175_v5 = vld [vmem:[%s166_s22 + $0x8] sm:$0x3f]  ;;  %v176_v6 = vld [vmem:[%s166_s22 + $0x10] sm:$0x3f] }
  0x11   : > { %v177_v7 = vld [vmem:[%s166_s22 + $0x18] sm:$0x3f] }
  0x86   : > { %v182_v3 = vpop.permute.xlu0 %181 }
  0x87   : > { %v184_v8 = vmul.f32 %v182_v3, %v174_v4  ;;  %v185_v9 = vmul.f32 %v182_v3, %v175_v5  ;;  %v186_v11 = vmul.f32 %v182_v3, %v176_v6  ;;  %v187_v14 = vmul.f32 %v182_v3, %v177_v7 }
  0x8a   : > { %v192_v10 = vpop.permute.xlu0 %191 }
  0x8b   : > { %v194_v12 = vadd.f32 %v192_v10, %v184_v8  ;;  %v195_v13 = vadd.f32 %v192_v10, %v185_v9  ;;  %v196_v15 = vadd.f32 %v192_v10, %v186_v11  ;;  %v197_v16 = vadd.f32 %v192_v10, %v187_v14 }
  0x8d   : > { %198 = vst [vmem:[%s172_s25] sm:$0x3f] %v194_v12  ;;  %199 = vst [vmem:[%s172_s25 + $0x8] sm:$0x3f] %v195_v13 }
  0x8e   : > { %200 = vst [vmem:[%s172_s25 + $0x10] sm:$0x3f] %v196_v15  ;;  %201 = vst [vmem:[%s172_s25 + $0x18] sm:$0x3f] %v197_v16 }
  0x8f PF: > { %s13_s12 = sadd.s32 1, %s285_s12  }
  0x90   : > { %p10_p4 = scmp.ge.s32.totalorder %s13_s12, 4  }
  0x92   :  { %12 = sbr.rel (!%p10_p4) target bundleno = 1 (0x1), region = 62 }

</bundles_post_ra>
